<compile_context>
chip_gen: v5e
topology: v5e:2x2
jax: 0.10.0
libtpu: 0.0.40
codegen_flags: <defaults>
</compile_context>

<pallas_src>
import jax
import jax.numpy as jnp
from jax.experimental import pallas as pl
from jax.experimental.pallas import tpu as pltpu


def _round_up(n, m):
    return (n + m - 1) // m * m


def _pick_tm(b_pad, tm_max):
    """Pick a batch tile: multiple of 8, divides b_pad (no wasted padded tiles),
    and small enough to keep >=2 grid steps when possible (v7x 2-TC sharding)."""
    if b_pad <= 8:
        return 8
    cap = min(tm_max, max(8, (b_pad // 2 // 8) * 8))   # keep at least 2 steps
    tm = cap - (cap % 8)
    while tm > 8 and b_pad % tm != 0:
        tm -= 8
    return max(tm, 8)


def _mlp_kernel(x_ref, w1_ref, b1_ref, w2_ref, b2_ref, o_ref):
    # Layer 0: Linear(in_f -> hidden).  MXU fed in the weights' dtype
    # (bf16 on v6e/v7x), f32 accumulation.  K=20 is fine for a mem-bound kernel;
    # no MXU-shape tuning is worthwhile at this arithmetic intensity.
    x = x_ref[...].astype(w1_ref.dtype)
    h = jnp.dot(x, w1_ref[...], preferred_element_type=jnp.float32)
    # Layer 1: bias + ReLU in f32 on the VPU (native on every generation).
    h = jnp.maximum(h + b1_ref[...], 0.0)
    # Layer 2: Linear(hidden -> out_pad); output block is 128-lane dense.
    y = jnp.dot(h.astype(w2_ref.dtype), w2_ref[...],
                preferred_element_type=jnp.float32)
    o_ref[...] = (y + b2_ref[...]).astype(o_ref.dtype)


def prepare_params(w1, b1, w2, b2, compute_dtype=jnp.bfloat16):
    """Pad/cast the Sequential's parameters ONCE (hoisted out of forward).

    w1: (in_f, hidden), b1: (hidden,), w2: (hidden, out_f), b2: (out_f,)
    Weights are stored (in, out) so the kernel computes y = x @ W + b
    (== PyTorch's x @ W.T with W of shape (out, in)).
    """
    hidden = w1.shape[1]
    out_f = w2.shape[1]
    out_pad = _round_up(out_f, 128)          # lane-dense output slab

    w1c = w1.astype(compute_dtype)                                   # full block, no pad
    b1r = b1.astype(jnp.float32).reshape(1, hidden)
    w2p = jnp.zeros((hidden, out_pad), compute_dtype).at[:, :out_f].set(
        w2.astype(compute_dtype))
    b2p = jnp.zeros((1, out_pad), jnp.float32).at[0, :out_f].set(
        b2.astype(jnp.float32))
    return (w1c, b1r, w2p, b2p, out_f)


def my_sequential_forward(x, params, *, tm_max=1024):
    """Fused MySequential(Linear, ReLU, Linear) forward as one Pallas call.

    x: (batch, in_f) f32.  `params` comes from prepare_params() (cached).
    Output dtype == compute dtype (bf16 by default); cast downstream if f32
    is required.
    """
    w1c, b1r, w2p, b2p, out_f = params
    batch, in_f = x.shape
    hidden = w1c.shape[1]
    out_pad = w2p.shape[1]
    out_dtype = w1c.dtype

    # Pad batch only to the sublane multiple (8); tm is then a divisor of b_pad.
    b_pad = _round_up(batch, 8)
    tm = _pick_tm(b_pad, tm_max)
    xp = x if b_pad == batch else jnp.zeros((b_pad, in_f), x.dtype).at[:batch].set(x)

    grid = (b_pad // tm,)

    flops = 2 * b_pad * (in_f * hidden + hidden * out_pad)
    bytes_accessed = (
        b_pad * in_f * x.dtype.itemsize
        + w1c.size * w1c.dtype.itemsize + b1r.size * 4
        + w2p.size * w2p.dtype.itemsize + b2p.size * 4
        + b_pad * out_pad * jnp.dtype(out_dtype).itemsize)

    out = pl.pallas_call(
        _mlp_kernel,
        out_shape=jax.ShapeDtypeStruct((b_pad, out_pad), out_dtype),
        grid=grid,
        in_specs=[
            # x at its true width (in_f): block dim == full array dim -> exempt
            # from the 128-lane divisibility rule; no host-side column padding.
            pl.BlockSpec((tm, in_f), lambda i: (i, 0)),
            pl.BlockSpec((in_f, hidden), lambda i: (0, 0)),   # w1: VMEM-resident
            pl.BlockSpec((1, hidden), lambda i: (0, 0)),      # b1: VMEM-resident
            pl.BlockSpec((hidden, out_pad), lambda i: (0, 0)),  # w2: VMEM-resident
            pl.BlockSpec((1, out_pad), lambda i: (0, 0)),     # b2: VMEM-resident
        ],
        out_specs=pl.BlockSpec((tm, out_pad), lambda i: (i, 0)),
        compiler_params=pltpu.CompilerParams(
            dimension_semantics=("parallel",)),
        cost_estimate=pl.CostEstimate(
            flops=flops, transcendentals=0, bytes_accessed=bytes_accessed),
    )(xp, w1c, b1r, w2p, b2p)

    # Lane-only slice when no batch rows were padded (cheaper copy).
    if b_pad == batch:
        return out[:, :out_f]
    return out[:batch, :out_f]


def _init_linear(key, fan_in, fan_out, dtype=jnp.float32):
    """Deterministic PyTorch-style Linear init: U(-1/sqrt(fan_in), 1/sqrt(fan_in))."""
    kw, kb = jax.random.split(key)
    bound = 1.0 / (fan_in ** 0.5)
    w = jax.random.uniform(kw, (fan_in, fan_out), dtype, minval=-bound, maxval=bound)
    b = jax.random.uniform(kb, (fan_out,), dtype, minval=-bound, maxval=bound)
    return w, b


if __name__ == "__main__":
    key = jax.random.PRNGKey(0)
    k_x, k_l1, k_l2 = jax.random.split(key, 3)

    batch, in_f, hidden, out_f = 2, 20, 256, 10

    x = jax.random.normal(k_x, (batch, in_f), jnp.float32)
    w1, b1 = _init_linear(k_l1, in_f, hidden)
    w2, b2 = _init_linear(k_l2, hidden, out_f)

    # Parameter prep (pad / cast) done ONCE; reused across forward calls.
    params_bf16 = prepare_params(w1, b1, w2, b2, compute_dtype=jnp.bfloat16)
    params_f32 = prepare_params(w1, b1, w2, b2, compute_dtype=jnp.float32)

    # Default path: bf16-fed MXU, f32 accumulation, bf16 output slab.
    y = my_sequential_forward(x, params_bf16)
    jax.block_until_ready(y)

    # Pure-f32 MXU path (bit-comparable to the reference).
    y_f32 = my_sequential_forward(x, params_f32)
    jax.block_until_ready(y_f32)

    # Pure-JAX reference for the same sequential forward.
    ref = jnp.maximum(x @ w1 + b1, 0.0) @ w2 + b2

    assert y.shape == (batch, out_f)
    assert jnp.allclose(y_f32, ref, atol=1e-5, rtol=1e-5)
    assert jnp.allclose(y.astype(jnp.float32), ref, atol=1e-2, rtol=1e-2)

    print("KERNEL_OK")
</pallas_src>

<mosaic_0001>
module attributes {stable_mosaic.version = 11 : i64} {
  func.func @_mlp_kernel(%arg0: i32, %arg1: memref<8x20xf32, #tpu.memory_space<vmem>>, %arg2: memref<20x256xbf16, #tpu.memory_space<vmem>>, %arg3: memref<1x256xf32, #tpu.memory_space<vmem>>, %arg4: memref<256x128xbf16, #tpu.memory_space<vmem>>, %arg5: memref<1x128xf32, #tpu.memory_space<vmem>>, %arg6: memref<8x128xbf16, #tpu.memory_space<vmem>>) attributes {dimension_semantics = [#tpu.dimension_semantics<parallel>], iteration_bounds = array<i64: 1>, scalar_prefetch = 0 : i64, scratch_operands = 0 : i64, tpu.core_type = #tpu.core_type<tc>, window_params = [{transform_indices = @transform_0, window_bounds = array<i64: 8, 20>}, {pipeline_mode = #tpu.pipeline_mode<synchronous>, transform_indices = @transform_1, window_bounds = array<i64: 20, 256>}, {pipeline_mode = #tpu.pipeline_mode<synchronous>, transform_indices = @transform_2, window_bounds = array<i64: 1, 256>}, {pipeline_mode = #tpu.pipeline_mode<synchronous>, transform_indices = @transform_3, window_bounds = array<i64: 256, 128>}, {pipeline_mode = #tpu.pipeline_mode<synchronous>, transform_indices = @transform_4, window_bounds = array<i64: 1, 128>}, {transform_indices = @transform_5, window_bounds = array<i64: 8, 128>}]} {
    %c0 = arith.constant 0 : index
    %c0_0 = arith.constant 0 : index
    %0 = vector.load %arg1[%c0, %c0_0] : memref<8x20xf32, #tpu.memory_space<vmem>>, vector<8x20xf32>
    %1 = arith.truncf %0 : vector<8x20xf32> to vector<8x20xbf16>
    %c0_1 = arith.constant 0 : index
    %c0_2 = arith.constant 0 : index
    %2 = vector.load %arg2[%c0_1, %c0_2] : memref<20x256xbf16, #tpu.memory_space<vmem>>, vector<20x256xbf16>
    %cst = arith.constant dense<0.000000e+00> : vector<8x256xf32>
    %3 = tpu.matmul %1, %2, %cst {dimension_numbers = #tpu.dot_dimension_numbers<[1], [0], [0], [1], [0, 0, 1, 1], [], []>} : vector<8x20xbf16>, vector<20x256xbf16>, vector<8x256xf32> -> vector<8x256xf32>
    %c0_3 = arith.constant 0 : index
    %c0_4 = arith.constant 0 : index
    %4 = vector.load %arg3[%c0_3, %c0_4] : memref<1x256xf32, #tpu.memory_space<vmem>>, vector<1x256xf32>
    %5 = vector.broadcast %4 : vector<1x256xf32> to vector<8x256xf32>
    %6 = arith.addf %3, %5 : vector<8x256xf32>
    %cst_5 = arith.constant 0.000000e+00 : f32
    %7 = vector.broadcast %cst_5 : f32 to vector<8x256xf32>
    %8 = arith.maximumf %6, %7 : vector<8x256xf32>
    %9 = arith.truncf %8 : vector<8x256xf32> to vector<8x256xbf16>
    %c0_6 = arith.constant 0 : index
    %c0_7 = arith.constant 0 : index
    %10 = vector.load %arg4[%c0_6, %c0_7] : memref<256x128xbf16, #tpu.memory_space<vmem>>, vector<256x128xbf16>
    %cst_8 = arith.constant dense<0.000000e+00> : vector<8x128xf32>
    %11 = tpu.matmul %9, %10, %cst_8 {dimension_numbers = #tpu.dot_dimension_numbers<[1], [0], [0], [1], [0, 0, 1, 1], [], []>} : vector<8x256xbf16>, vector<256x128xbf16>, vector<8x128xf32> -> vector<8x128xf32>
    %c0_9 = arith.constant 0 : index
    %c0_10 = arith.constant 0 : index
    %12 = vector.load %arg5[%c0_9, %c0_10] : memref<1x128xf32, #tpu.memory_space<vmem>>, vector<1x128xf32>
    %13 = vector.broadcast %12 : vector<1x128xf32> to vector<8x128xf32>
    %14 = arith.addf %11, %13 : vector<8x128xf32>
    %15 = arith.truncf %14 : vector<8x128xf32> to vector<8x128xbf16>
    %c0_11 = arith.constant 0 : index
    %c0_12 = arith.constant 0 : index
    %16 = vector.load %arg6[%c0_11, %c0_12] : memref<8x128xbf16, #tpu.memory_space<vmem>>, vector<8x128xbf16>
    tpu.vector_store %arg6[%c0_11, %c0_12], %15 {strides = array<i32>} : memref<8x128xbf16, #tpu.memory_space<vmem>>, vector<8x128xbf16>,
    return
  }
  func.func @transform_0(%arg0: i32) -> (i32, i32) {
    %c0_i32 = arith.constant 0 : i32
    %c0_i32_0 = arith.constant 0 : i32
    return %arg0, %c0_i32 : i32, i32
  }
  func.func @transform_1(%arg0: i32) -> (i32, i32) {
    %c0_i32 = arith.constant 0 : i32
    %c0_i32_0 = arith.constant 0 : i32
    %c0_i32_1 = arith.constant 0 : i32
    return %c0_i32, %c0_i32_0 : i32, i32
  }
  func.func @transform_2(%arg0: i32) -> (i32, i32) {
    %c0_i32 = arith.constant 0 : i32
    %c0_i32_0 = arith.constant 0 : i32
    %c0_i32_1 = arith.constant 0 : i32
    return %c0_i32, %c0_i32_0 : i32, i32
  }
  func.func @transform_3(%arg0: i32) -> (i32, i32) {
    %c0_i32 = arith.constant 0 : i32
    %c0_i32_0 = arith.constant 0 : i32
    %c0_i32_1 = arith.constant 0 : i32
    return %c0_i32, %c0_i32_0 : i32, i32
  }
  func.func @transform_4(%arg0: i32) -> (i32, i32) {
    %c0_i32 = arith.constant 0 : i32
    %c0_i32_0 = arith.constant 0 : i32
    %c0_i32_1 = arith.constant 0 : i32
    return %c0_i32, %c0_i32_0 : i32, i32
  }
  func.func @transform_5(%arg0: i32) -> (i32, i32) {
    %c0_i32 = arith.constant 0 : i32
    %c0_i32_0 = arith.constant 0 : i32
    return %arg0, %c0_i32 : i32, i32
  }
}

</mosaic_0001>

<bundles_post_ra>
// kernel: tpu_custom_call.1
= control target key start
LH: loop header
LB: loop body
LE: loop exit
PB: predicated region body
PF: predicated region fallthrough
CT: control target
= control target key end

     0   :  { %10 = vsyncpa [#allocation3], 0  ;;  %s614_s0 = inlined_call_operand.hbm [shape: f32[8,20], index: 0, kind: input, shape index: {}]   ;;  %s615_s1 = inlined_call_operand.hbm [shape: bf16[20,256], index: 1, kind: input, shape index: {}]   ;;  %s616_s2 = inlined_call_operand.hbm [shape: f32[1,256], index: 2, kind: input, shape index: {}]   ;;  %s617_s3 = inlined_call_operand.hbm [shape: bf16[256,128], index: 3, kind: input, shape index: {}]   ;;  %s618_s4 = inlined_call_operand.vmem [shape: f32[1,128], index: 4, kind: input, shape index: {}]   ;;  %s619_s5 = inlined_call_operand.hbm [shape: bf16[8,128], index: 5, kind: output, shape index: {}]  }
   0x1   :  { %11 = vsyncpa [#allocation6], 0 }
   0x2   :  { %12 = vsyncpa [#allocation9], 0  ;;  %s29_s20 = sshll.u32 %s615_s1, 4  ;;  %s30_s20 = int_to_ptr.hbm [resolvable:$true] %s29_s20 }
   0x3   :  { %13 = vsyncpa [#allocation4], 0  ;;  %s557_s21 = smov [#allocation5]   ;;  %s19_s25 = sshll.u32 %s614_s0, 4  ;;  %s20_s25 = int_to_ptr.hbm [resolvable:$true] %s19_s25 }
   0x4   :  { %s31_s22 = sshll.u32 %s557_s21, 4  ;;  %s558_s26 = smov 128   ;;  %s32_s22 = int_to_ptr.vmem [resolvable:$true] %s31_s22 }
   0x5   :  { %s559_s27 = smov 8   ;;  %s560_s28 = smov [#allocation2]  }
   0x6   :  { %37 = dma.hbm_to_vmem [thread:$0]  %s30_s20, 384, %s32_s22, [#allocation6], %s558_s26, %s558_s26, %s559_s27  }
   0x7   :  { %s21_s29 = sshll.u32 %s560_s28, 4  ;;  %s43_s7 = sshll.u32 %s616_s2, 4  ;;  %s22_s29 = int_to_ptr.vmem [resolvable:$true] %s21_s29  ;;  %s44_s7 = int_to_ptr.hbm [resolvable:$true] %s43_s7 }
   0x8   :  { %24 = dma.hbm_to_vmem [thread:$0]  %s20_s25, 128, %s22_s29, [#allocation3]  }
   0x9   :  { %s53_s9 = sshll.u32 %s617_s3, 4  ;;  %s561_s10 = smov [#allocation7]   ;;  %s54_s9 = int_to_ptr.hbm [resolvable:$true] %s53_s9 }
   0xa   :  { %s45_s11 = sshll.u32 %s561_s10, 4  ;;  %s562_s0 = smov [#allocation8]   ;;  %s46_s11 = int_to_ptr.vmem [resolvable:$true] %s45_s11 }
   0xb   :  { %48 = dma.hbm_to_vmem [thread:$0]  %s44_s7, 32, %s46_s11, [#allocation6]  }
   0xc   :  { %s55_s12 = sshll.u32 %s562_s0, 4  ;;  %s563_s13 = smov 64   ;;  %s56_s12 = int_to_ptr.vmem [resolvable:$true] %s55_s12 }
   0xd   :  { %s564_s14 = smov 4  }
   0xe   :  { %61 = dma.hbm_to_vmem [thread:$0]  %s54_s9, 2048, %s56_s12, [#allocation9], %s563_s13, %s563_s13, %s564_s14  }
   0xf   :  { %549 = dma.done.wait [#allocation3], 128  }
  0x10   :  { %550 = vsyncadd [#allocation3], 4294967168 }
  0x11   :  { %551 = dma.done.wait [#allocation6], 416  }
  0x12   :  { %552 = vsyncadd [#allocation6], 4294966880 }
  0x13   :  { %553 = dma.done.wait [#allocation9], 2048  }
  0x14   :  { %554 = vsyncadd [#allocation9], 4294965248  ;;  %v85_v0 = vld [vmem:[#allocation5 + $0x10] sm:$0x33]  ;;  %vm111_vm0 = vcmask 1041408   ;;  %v81_v17 = vld [vmem:[#allocation2] sm:$0xff] }
  0x15   :  { %v99_v1 = vunpack.c.l.b16 %v85_v0  ;;  %v100_v2 = vunpack.c.h.b16 %v85_v0  ;;  %v329_v3 = vld [vmem:[#allocation5] sm:$0xf]  ;;  %v410_v4 = vld [vmem:[#allocation8 + $0x38] sm:$0xff]  ;;  %v402_v8 = vld [vmem:[#allocation5 + $0x4] sm:$0xf0]  ;;  %v82_v20 = vpack.c.bf16 %v81_v17, %v81_v17  ;;  %vm107_vm1 = vcmask 162816  }
  0x16   :  { %v418_v5 = vld [vmem:[#allocation8 + $0x78] sm:$0xff]  ;;  %v401_v9 = vld [vmem:[#allocation5 + $0x4] sm:$0xf]  ;;  %v331_v10 = vld [vmem:[#allocation5 + $0x8] sm:$0xf0]  ;;  %280 = vmatpush.bf16.msra.mxu2 %v410_v4  ;;  %v330_v15 = vor.u32 %v402_v8, %v329_v3  ;;  %s565_s15 = smov [#allocation10]  }
  0x17   :  { %v103_v6 = vpack.c.b16 %v99_v1, %v99_v1  ;;  %v104_v7 = vpack.c.b16 %v100_v2, %v100_v2  ;;  %293 = vmatpush.bf16.msra.mxu3 %v418_v5  ;;  %v409_v11 = vld [vmem:[#allocation8 + $0x30] sm:$0xff]  ;;  %v334_v16 = vor.u32 %v401_v9, %v331_v10  ;;  %v408_v18 = vld [vmem:[#allocation8 + $0x28] sm:$0xff]  ;;  %v407_v21 = vld [vmem:[#allocation8 + $0x20] sm:$0xff]  ;;  %s313_s16 = sshll.u32 %s565_s15, 4  ;;  %s315_s19 = sshll.u32 %s619_s5, 4  ;;  %s314_s16 = int_to_ptr.vmem [resolvable:$true] %s313_s16  ;;  %s316_s19 = int_to_ptr.hbm [resolvable:$true] %s315_s19 }
  0x18   :  { %v417_v12 = vld [vmem:[#allocation8 + $0x70] sm:$0xff]  ;;  %v416_v19 = vld [vmem:[#allocation8 + $0x68] sm:$0xff]  ;;  %v415_v22 = vld [vmem:[#allocation8 + $0x60] sm:$0xff] }
  0x19   :  { %v113_v13 = vsel %vm111_vm0, %v103_v6, 0  ;;  %v116_v14 = vsel %vm111_vm0, %v104_v7, 0  ;;  %v406_v23 = vld [vmem:[#allocation8 + $0x18] sm:$0xff]  ;;  %v405_v25 = vld [vmem:[#allocation8 + $0x10] sm:$0xff]  ;;  %v404_v27 = vld [vmem:[#allocation8 + $0x8] sm:$0xff] }
  0x1a   :  { %124 = vmatpush.bf16.msra.mxu0 %v113_v13  ;;  %137 = vmatpush.bf16.msra.mxu1 %v116_v14  ;;  %v414_v24 = vld [vmem:[#allocation8 + $0x58] sm:$0xff]  ;;  %v413_v26 = vld [vmem:[#allocation8 + $0x50] sm:$0xff]  ;;  %v412_v28 = vld [vmem:[#allocation8 + $0x48] sm:$0xff] }
  0x1b   :  { %281 = vmatpush.bf16.msra.mxu2 %v409_v11  ;;  %294 = vmatpush.bf16.msra.mxu3 %v417_v12  ;;  %v403_v29 = vld [vmem:[#allocation8] sm:$0xff]  ;;  %v86_v31 = vld [vmem:[#allocation7] sm:$0x3] }
  0x1c   :  { %v411_v30 = vld [vmem:[#allocation8 + $0x40] sm:$0xff]  ;;  %v88_v32 = vperm.slane %v86_v31, 0  ;;  %v89_v33 = vperm.slane %v86_v31, 1  ;;  %v428_v44 = vld [vmem:[%s618_s4] ss:$0 sm:$0xff] }
  0x1e   :  { %125 = vmatpush.bf16.msra.mxu0 %v330_v15  ;;  %138 = vmatpush.bf16.msra.mxu1 %v334_v16 }
  0x1f   :  { %282 = vmatpush.bf16.msra.mxu2 %v408_v18  ;;  %295 = vmatpush.bf16.msra.mxu3 %v416_v19 }
  0x21   :  { %335 = vmatmul.msk.bf16.vlgmr.msra.gmra.mxu0 %vm107_vm1, %v82_v20  ;;  %336 = vmatmul.msk.bf16.vlgmr.msra.gmra.mxu1 %vm107_vm1, %v82_v20 }
  0x23   :  { %283 = vmatpush.bf16.msra.mxu2 %v407_v21  ;;  %296 = vmatpush.bf16.msra.mxu3 %v415_v22 }
  0x27   :  { %284 = vmatpush.bf16.msra.mxu2 %v406_v23  ;;  %297 = vmatpush.bf16.msra.mxu3 %v414_v24 }
  0x2b   :  { %285 = vmatpush.bf16.msra.mxu2 %v405_v25  ;;  %298 = vmatpush.bf16.msra.mxu3 %v413_v26 }
  0x2f   :  { %286 = vmatpush.bf16.msra.mxu2 %v404_v27  ;;  %299 = vmatpush.bf16.msra.mxu3 %v412_v28 }
  0x33   :  { %287 = vmatpush.bf16.msra.mxu2 %v403_v29  ;;  %300 = vmatpush.bf16.msra.mxu3 %v411_v30 }
  0x9e   :  { %v127_v34 = vpop.f32.mrf.mxu0  ;;  %v140_v35 = vpop.f32.mrf.mxu1 }
  0x9f   :  { %v128_v36 = vadd.f32 %v127_v34, %v88_v32  ;;  %v141_v37 = vadd.f32 %v140_v35, %v89_v33 }
  0xa1   :  { %v144_v38 = vmax.f32 %v128_v36, 0.0  ;;  %v145_v39 = vmax.f32 %v141_v37, 0.0 }
  0xa3   :  { %v146_v40 = vpack.c.bf16 %v144_v38, %v144_v38  ;;  %v147_v41 = vpack.c.bf16 %v145_v39, %v145_v39 }
  0xa5   :  { %288 = vmatmul.bf16.vlgmr.msra.gmra.mxu2 %v146_v40  ;;  %301 = vmatmul.bf16.vlgmr.msra.gmra.mxu3 %v147_v41 }
  0xa6   :  { %v129_v42 = vpop.f32.mrf.mxu0  ;;  %v142_v43 = vpop.f32.mrf.mxu1 }
 0x128   :  { %v289_v45 = vpop.f32.mrf.mxu2  ;;  %v302_v46 = vpop.f32.mrf.mxu3 }
 0x129   :  { %v290_v47 = vadd.f32 %v428_v44, %v289_v45 }
 0x12b   :  { %v303_v48 = vadd.f32 %v302_v46, %v290_v47 }
 0x12d   :  { %v306_v49 = vpack.c.bf16 %v303_v48, %v303_v48 }
 0x12f   :  { %307 = vst [vmem:[#allocation10] sm:$0xf] %v306_v49 }
 0x130   :  { %v291_v50 = vpop.f32.mrf.mxu2  ;;  %v304_v51 = vpop.f32.mrf.mxu3  ;;  %318 = dma.vmem_to_hbm [thread:$0]  %s314_s16, 64, %s316_s19, [#allocation4]  }
 0x131   :  { %555 = dma.done.wait [#allocation4], 64  }
 0x132   :  { %556 = vsyncadd [#allocation4], 4294967232 }
 0x133   :  { %323 = vsyncpa [#allocation3], 1 }
 0x134   :  { %324 = vsyncpa [#allocation6], 1 }
 0x135   :  { %325 = vsyncpa [#allocation9], 1 }
 0x136   :  { %326 = vsyncpa [#allocation4], 1 }

</bundles_post_ra>
